<compile_context>
chip_gen: v5e
topology: v5e:2x2
jax: 0.10.0
libtpu: 0.0.40
codegen_flags: <defaults>
</compile_context>

<pallas_src>
import jax
import jax.numpy as jnp
from jax.experimental import pallas as pl
from jax.experimental.pallas import tpu as pltpu


def _round_up(x, m):
    return ((x + m - 1) // m) * m


# ---------------------------------------------------------------------------
# Kernels
# ---------------------------------------------------------------------------

def _cross_gate_kernel(x1_ref, x2_ref, w1t_ref, w2t_ref, o1_ref, o2_ref):
    """Single-axis path: full (padded) weights resident in VMEM."""
    x1 = x1_ref[...]
    x2 = x2_ref[...]
    x1_bf = x1.astype(jnp.bfloat16)
    x2_bf = x2.astype(jnp.bfloat16)

    # g1 = sigmoid(x1 @ W1^T); x2_ = g1 * x2
    g1 = jax.nn.sigmoid(
        jnp.dot(x1_bf, w1t_ref[...], preferred_element_type=jnp.float32))
    o2_ref[...] = (g1 * x2.astype(jnp.float32)).astype(o2_ref.dtype)

    # g2 = sigmoid(x2 @ W2^T); x1_ = g2 * x1
    g2 = jax.nn.sigmoid(
        jnp.dot(x2_bf, w2t_ref[...], preferred_element_type=jnp.float32))
    o1_ref[...] = (g2 * x1.astype(jnp.float32)).astype(o1_ref.dtype)


def _cross_gate_kernel_ntiled(x1_ref, x2_ref, w1t_ref, w2t_ref, o1_ref, o2_ref):
    """N-tiled path for large d_model.

    x1/x2 row tiles are full-width and stay resident across the inner
    (output-column) grid axis; weights and outputs are tiled along columns.
    """
    tn = o1_ref.shape[1]
    off = pl.multiple_of(pl.program_id(1) * tn, 128)

    x1_bf = x1_ref[...].astype(jnp.bfloat16)
    x2_bf = x2_ref[...].astype(jnp.bfloat16)
    x1_blk = x1_ref[:, pl.ds(off, tn)].astype(jnp.float32)
    x2_blk = x2_ref[:, pl.ds(off, tn)].astype(jnp.float32)

    g1 = jax.nn.sigmoid(
        jnp.dot(x1_bf, w1t_ref[...], preferred_element_type=jnp.float32))
    o2_ref[...] = (g1 * x2_blk).astype(o2_ref.dtype)

    g2 = jax.nn.sigmoid(
        jnp.dot(x2_bf, w2t_ref[...], preferred_element_type=jnp.float32))
    o1_ref[...] = (g2 * x1_blk).astype(o1_ref.dtype)


# ---------------------------------------------------------------------------
# VMEM accounting / hardware queries
# ---------------------------------------------------------------------------

def _vmem_capacity_bytes():
    try:
        cap = int(pltpu.get_tpu_info().vmem_capacity_bytes)
        if cap > 0:
            return cap
    except Exception:
        pass
    return 64 * 1024 * 1024  # conservative fallback: valid on every generation


def _vmem_single_axis(tm, d_pad, io_bytes, w_buffers):
    w = 2 * w_buffers * d_pad * d_pad * 2        # 2 weights, bf16
    act = 4 * 2 * tm * d_pad * io_bytes          # x1,x2,o1,o2 double-buffered
    scratch = 6 * tm * d_pad * 4                 # f32 temporaries (g, casts)
    return w + act + scratch


def _vmem_ntiled(tm, tn, d_pad, io_bytes):
    w = 2 * 2 * d_pad * tn * 2                   # 2 weight column-blocks, dbl-buffered
    x_in = 2 * 2 * tm * d_pad * io_bytes         # x1,x2 full-width, dbl-buffered
    o_out = 2 * 2 * tm * tn * io_bytes           # o1,o2 dbl-buffered
    scratch = 2 * tm * d_pad * 4 + 6 * tm * tn * 4
    return w + x_in + o_out + scratch


_WEIGHT_SINGLE_BUFFER_OK = hasattr(pl, "Buffered")


def _weight_spec(block_shape, index_map, single_buffer):
    if single_buffer and _WEIGHT_SINGLE_BUFFER_OK:
        try:
            # Weights sit at a constant block index: single-buffer them to
            # reclaim d_pad^2 bf16 bytes each (the reclaimed VMEM goes straight
            # into a larger row tile on v7x).
            return pl.BlockSpec(block_shape, index_map,
                                pipeline_mode=pl.Buffered(1))
        except TypeError:
            pass
    return pl.BlockSpec(block_shape, index_map)


# ---------------------------------------------------------------------------
# Wrapper
# ---------------------------------------------------------------------------

def cross_gate(x1, x2, w1, w2, *, tm=512, tn=None):
    """Pallas implementation of CrossGate.forward.

    x1, x2: (..., d_model)
    w1, w2: (d_model, d_model) PyTorch nn.Linear weights (out_features,
            in_features), bias=False.
    Returns (x1_, x2_) with the inputs' shape/dtype.  All tiling decisions are
    static functions of the shapes, so the function is jit-compatible.
    """
    assert x1.shape == x2.shape and x1.dtype == x2.dtype
    orig_shape = x1.shape
    d = orig_shape[-1]
    assert w1.shape == (d, d) and w2.shape == (d, d)

    x1f = x1.reshape(-1, d)
    x2f = x2.reshape(-1, d)
    n = x1f.shape[0]
    io_bytes = x1.dtype.itemsize

    # Lane-dense feature dim.  When d is already a multiple of 128 there is NO
    # wrapper-side padding or output slicing (those are extra HBM passes in a
    # bandwidth-bound op); ragged token counts are handled by Pallas boundary
    # blocks (pl.cdiv grid + masked writes), never by padding rows.
    d_pad = _round_up(d, 128)
    pad_cols = d_pad != d
    if pad_cols:
        # Zero-padding is exact: padded in-features contribute 0 to the dot,
        # padded out-features are gated against zero columns and sliced off.
        x1f = jnp.pad(x1f, ((0, 0), (0, d_pad - d)))
        x2f = jnp.pad(x2f, ((0, 0), (0, d_pad - d)))

    def _prep_w(w):
        wt = w.T
        if pad_cols:
            wt = jnp.pad(wt, ((0, d_pad - d), (0, d_pad - d)))
        return wt.astype(jnp.bfloat16)

    w1t = _prep_w(w1)
    w2t = _prep_w(w2)

    # Generation-aware VMEM budget (v5e/v6e: 128 MiB, v7x: 64 MiB/TC).
    vmem_cap = _vmem_capacity_bytes()
    budget = (vmem_cap * 3) // 4
    limit_cap = min((vmem_cap * 7) // 8, vmem_cap - 4 * 1024 * 1024)

    # Row tile: as large as possible, but (a) no bigger than the token count,
    # (b) small enough that the grid has >= ~4 steps when n permits (both v7x
    # TensorCores busy, DMA pipelining enabled), (c) within the VMEM budget.
    tm_eff = max(8, min(tm, _round_up(n, 8), _round_up(pl.cdiv(n, 4), 8)))

    def _launch(single_buffer_weights):
        w_buffers = 1 if (single_buffer_weights and _WEIGHT_SINGLE_BUFFER_OK) else 2
        tm_blk = tm_eff

        # Use the weight-resident single-axis path while both full (padded)
        # weights fit in ~half the VMEM budget; otherwise tile the output dim.
        use_ntiled = (tn is not None) or (2 * w_buffers * d_pad * d_pad * 2 > budget // 2)

        if not use_ntiled:
            while tm_blk > 64 and _vmem_single_axis(tm_blk, d_pad, io_bytes,
                                                    w_buffers) > budget:
                tm_blk //= 2
            est = _vmem_single_axis(tm_blk, d_pad, io_bytes, w_buffers)
            grid = (pl.cdiv(n, tm_blk),)
            row_spec = pl.BlockSpec((tm_blk, d_pad), lambda i: (i, 0))
            w_spec = _weight_spec((d_pad, d_pad), lambda i: (0, 0),
                                  single_buffer_weights)
            in_specs = [row_spec, row_spec, w_spec, w_spec]
            out_specs = [row_spec, row_spec]
            kernel = _cross_gate_kernel
            semantics = ("parallel",)
        else:
            # tn must divide d_pad exactly (the in-kernel dynamic column slice
            # of the resident x tile must stay in bounds).
            tn_blk = tn
            if tn_blk is None:
                tn_blk = 512
                while tn_blk > 128 and d_pad % tn_blk != 0:
                    tn_blk //= 2
            assert d_pad % tn_blk == 0 and tn_blk % 128 == 0
            while (_vmem_ntiled(tm_blk, tn_blk, d_pad, io_bytes) > budget
                   and (tn_blk > 128 or tm_blk > 64)):
                if tn_blk > 128:
                    tn_blk //= 2
                else:
                    tm_blk //= 2
            # TODO(synk): also tile the K (reduction) dimension for extremely
            # large d_model where even a full-width x row tile overflows VMEM.
            est = _vmem_ntiled(tm_blk, tn_blk, d_pad, io_bytes)
            grid = (pl.cdiv(n, tm_blk), d_pad // tn_blk)
            x_spec = pl.BlockSpec((tm_blk, d_pad), lambda i, j: (i, 0))
            w_spec = pl.BlockSpec((d_pad, tn_blk), lambda i, j: (0, j))
            o_spec = pl.BlockSpec((tm_blk, tn_blk), lambda i, j: (i, j))
            in_specs = [x_spec, x_spec, w_spec, w_spec]
            out_specs = [o_spec, o_spec]
            kernel = _cross_gate_kernel_ntiled
            semantics = ("parallel", "parallel")

        # Always set the scoped-VMEM limit (v5e's default is only 16 MiB),
        # capped per generation (<= ~56 MiB on v7x's 64 MiB/TC).
        vmem_limit = int(min(limit_cap, max(32 * 1024 * 1024, (est * 5) // 4)))

        cost = pl.CostEstimate(
            flops=4 * n * d_pad * d_pad,              # two (n,d) x (d,d) matmuls
            transcendentals=2 * n * d_pad,            # two sigmoids
            bytes_accessed=4 * n * d_pad * io_bytes + 2 * d_pad * d_pad * 2,
        )

        return pl.pallas_call(
            kernel,
            out_shape=(
                jax.ShapeDtypeStruct((n, d_pad), x1.dtype),
                jax.ShapeDtypeStruct((n, d_pad), x2.dtype),
            ),
            grid_spec=pltpu.PrefetchScalarGridSpec(
                num_scalar_prefetch=0,
                grid=grid,
                in_specs=in_specs,
                out_specs=out_specs,
            ),
            compiler_params=pltpu.CompilerParams(
                dimension_semantics=semantics,
                vmem_limit_bytes=vmem_limit,
            ),
            cost_estimate=cost,
        )(x1f, x2f, w1t, w2t)

    global _WEIGHT_SINGLE_BUFFER_OK
    if _WEIGHT_SINGLE_BUFFER_OK:
        try:
            o1f, o2f = _launch(True)
        except Exception:
            # This jax build rejects single-buffered weight specs; fall back to
            # default double-buffering from now on.
            _WEIGHT_SINGLE_BUFFER_OK = False
            o1f, o2f = _launch(False)
    else:
        o1f, o2f = _launch(False)

    if pad_cols:
        o1f = o1f[:, :d]
        o2f = o2f[:, :d]
    return o1f.reshape(orig_shape), o2f.reshape(orig_shape)


# ---------------------------------------------------------------------------
# Reference + self-test
# ---------------------------------------------------------------------------

def _reference(x1, x2, w1, w2):
    g1 = jax.nn.sigmoid(x1 @ w1.T)
    x2_ = g1 * x2
    g2 = jax.nn.sigmoid(x2 @ w2.T)
    x1_ = g2 * x1
    return x1_, x2_


if __name__ == "__main__":
    key = jax.random.PRNGKey(0)

    def run_case(batch, seq, d_model, **kw):
        k1, k2, k3, k4 = jax.random.split(
            jax.random.fold_in(key, d_model * 1000 + seq), 4)
        # PyTorch nn.Linear(bias=False) init: (out, in), uniform(-1/sqrt(d), 1/sqrt(d)).
        bound = 1.0 / (d_model ** 0.5)
        w1 = jax.random.uniform(k1, (d_model, d_model), jnp.float32, -bound, bound)
        w2 = jax.random.uniform(k2, (d_model, d_model), jnp.float32, -bound, bound)
        x1 = jax.random.normal(k3, (batch, seq, d_model), jnp.float32)
        x2 = jax.random.normal(k4, (batch, seq, d_model), jnp.float32)

        out1, out2 = cross_gate(x1, x2, w1, w2, **kw)
        jax.block_until_ready((out1, out2))

        r1, r2 = _reference(x1, x2, w1, w2)
        assert out1.shape == x1.shape and out2.shape == x2.shape
        # bf16 MXU operands with f32 accumulation -> relaxed tolerance vs f32 ref.
        assert jnp.allclose(out1, r1, atol=3e-2, rtol=3e-2), ("x1 mismatch", batch, seq, d_model)
        assert jnp.allclose(out2, r2, atol=3e-2, rtol=3e-2), ("x2 mismatch", batch, seq, d_model)

    run_case(2, 8, 128)           # lane-dense fast path: no padding, no slicing
    run_case(2, 8, 32)            # d_model % 128 != 0 -> column pad/slice path
    run_case(2, 7, 128)           # ragged token count -> Pallas boundary block
    run_case(2, 8, 256, tn=128)   # exercise the N-tiled (large-d_model) path

    print("KERNEL_OK")
</pallas_src>

<mosaic_0001>
module attributes {stable_mosaic.version = 11 : i64} {
  func.func @_cross_gate_kernel(%arg0: i32, %arg1: memref<8x128xf32, #tpu.memory_space<vmem>>, %arg2: memref<8x128xf32, #tpu.memory_space<vmem>>, %arg3: memref<128x128xbf16, #tpu.memory_space<vmem>>, %arg4: memref<128x128xbf16, #tpu.memory_space<vmem>>, %arg5: memref<8x128xf32, #tpu.memory_space<vmem>>, %arg6: memref<8x128xf32, #tpu.memory_space<vmem>>) attributes {dimension_semantics = [#tpu.dimension_semantics<parallel>], iteration_bounds = array<i64: 2>, scalar_prefetch = 0 : i64, scratch_operands = 0 : i64, tpu.core_type = #tpu.core_type<tc>, window_params = [{transform_indices = @transform_0, window_bounds = array<i64: 8, 128>}, {transform_indices = @transform_1, window_bounds = array<i64: 8, 128>}, {pipeline_mode = #tpu.pipeline_mode<synchronous>, transform_indices = @transform_2, window_bounds = array<i64: 128, 128>}, {pipeline_mode = #tpu.pipeline_mode<synchronous>, transform_indices = @transform_3, window_bounds = array<i64: 128, 128>}, {transform_indices = @transform_4, window_bounds = array<i64: 8, 128>}, {transform_indices = @transform_5, window_bounds = array<i64: 8, 128>}]} {
    %c0 = arith.constant 0 : index
    %c0_0 = arith.constant 0 : index
    %0 = vector.load %arg1[%c0, %c0_0] : memref<8x128xf32, #tpu.memory_space<vmem>>, vector<8x128xf32>
    %c0_1 = arith.constant 0 : index
    %c0_2 = arith.constant 0 : index
    %1 = vector.load %arg2[%c0_1, %c0_2] : memref<8x128xf32, #tpu.memory_space<vmem>>, vector<8x128xf32>
    %2 = arith.truncf %0 : vector<8x128xf32> to vector<8x128xbf16>
    %3 = arith.truncf %1 : vector<8x128xf32> to vector<8x128xbf16>
    %c0_3 = arith.constant 0 : index
    %c0_4 = arith.constant 0 : index
    %4 = vector.load %arg3[%c0_3, %c0_4] : memref<128x128xbf16, #tpu.memory_space<vmem>>, vector<128x128xbf16>
    %cst = arith.constant dense<0.000000e+00> : vector<8x128xf32>
    %5 = tpu.matmul %2, %4, %cst {dimension_numbers = #tpu.dot_dimension_numbers<[1], [0], [0], [1], [0, 0, 1, 1], [], []>} : vector<8x128xbf16>, vector<128x128xbf16>, vector<8x128xf32> -> vector<8x128xf32>
    %6 = arith.negf %5 : vector<8x128xf32>
    %7 = math.exp %6 : vector<8x128xf32>
    %cst_5 = arith.constant 1.000000e+00 : f32
    %8 = vector.broadcast %cst_5 : f32 to vector<8x128xf32>
    %9 = arith.addf %8, %7 : vector<8x128xf32>
    %10 = arith.divf %8, %9 : vector<8x128xf32>
    %11 = arith.mulf %10, %1 : vector<8x128xf32>
    %c0_6 = arith.constant 0 : index
    %c0_7 = arith.constant 0 : index
    %12 = vector.load %arg6[%c0_6, %c0_7] : memref<8x128xf32, #tpu.memory_space<vmem>>, vector<8x128xf32>
    tpu.vector_store %arg6[%c0_6, %c0_7], %11 {strides = array<i32>} : memref<8x128xf32, #tpu.memory_space<vmem>>, vector<8x128xf32>,
    %c0_8 = arith.constant 0 : index
    %c0_9 = arith.constant 0 : index
    %13 = vector.load %arg4[%c0_8, %c0_9] : memref<128x128xbf16, #tpu.memory_space<vmem>>, vector<128x128xbf16>
    %cst_10 = arith.constant dense<0.000000e+00> : vector<8x128xf32>
    %14 = tpu.matmul %3, %13, %cst_10 {dimension_numbers = #tpu.dot_dimension_numbers<[1], [0], [0], [1], [0, 0, 1, 1], [], []>} : vector<8x128xbf16>, vector<128x128xbf16>, vector<8x128xf32> -> vector<8x128xf32>
    %15 = arith.negf %14 : vector<8x128xf32>
    %16 = math.exp %15 : vector<8x128xf32>
    %cst_11 = arith.constant 1.000000e+00 : f32
    %17 = vector.broadcast %cst_11 : f32 to vector<8x128xf32>
    %18 = arith.addf %17, %16 : vector<8x128xf32>
    %19 = arith.divf %17, %18 : vector<8x128xf32>
    %20 = arith.mulf %19, %0 : vector<8x128xf32>
    %c0_12 = arith.constant 0 : index
    %c0_13 = arith.constant 0 : index
    %21 = vector.load %arg5[%c0_12, %c0_13] : memref<8x128xf32, #tpu.memory_space<vmem>>, vector<8x128xf32>
    tpu.vector_store %arg5[%c0_12, %c0_13], %20 {strides = array<i32>} : memref<8x128xf32, #tpu.memory_space<vmem>>, vector<8x128xf32>,
    return
  }
  func.func @transform_0(%arg0: i32) -> (i32, i32) {
    %c0_i32 = arith.constant 0 : i32
    %c0_i32_0 = arith.constant 0 : i32
    return %arg0, %c0_i32 : i32, i32
  }
  func.func @transform_1(%arg0: i32) -> (i32, i32) {
    %c0_i32 = arith.constant 0 : i32
    %c0_i32_0 = arith.constant 0 : i32
    return %arg0, %c0_i32 : i32, i32
  }
  func.func @transform_2(%arg0: i32) -> (i32, i32) {
    %c0_i32 = arith.constant 0 : i32
    %c0_i32_0 = arith.constant 0 : i32
    %c0_i32_1 = arith.constant 0 : i32
    return %c0_i32, %c0_i32_0 : i32, i32
  }
  func.func @transform_3(%arg0: i32) -> (i32, i32) {
    %c0_i32 = arith.constant 0 : i32
    %c0_i32_0 = arith.constant 0 : i32
    %c0_i32_1 = arith.constant 0 : i32
    return %c0_i32, %c0_i32_0 : i32, i32
  }
  func.func @transform_4(%arg0: i32) -> (i32, i32) {
    %c0_i32 = arith.constant 0 : i32
    %c0_i32_0 = arith.constant 0 : i32
    return %arg0, %c0_i32 : i32, i32
  }
  func.func @transform_5(%arg0: i32) -> (i32, i32) {
    %c0_i32 = arith.constant 0 : i32
    %c0_i32_0 = arith.constant 0 : i32
    return %arg0, %c0_i32 : i32, i32
  }
}

module attributes {stable_mosaic.version = 11 : i64} {
  func.func @_cross_gate_kernel(%arg0: i32, %arg1: memref<8x128xf32, #tpu.memory_space<vmem>>, %arg2: memref<8x128xf32, #tpu.memory_space<vmem>>, %arg3: memref<128x128xbf16, #tpu.memory_space<vmem>>, %arg4: memref<128x128xbf16, #tpu.memory_space<vmem>>, %arg5: memref<8x128xf32, #tpu.memory_space<vmem>>, %arg6: memref<8x128xf32, #tpu.memory_space<vmem>>) attributes {dimension_semantics = [#tpu.dimension_semantics<parallel>], iteration_bounds = array<i64: 2>, scalar_prefetch = 0 : i64, scratch_operands = 0 : i64, tpu.core_type = #tpu.core_type<tc>, window_params = [{transform_indices = @transform_0, window_bounds = array<i64: 8, 128>}, {transform_indices = @transform_1, window_bounds = array<i64: 8, 128>}, {pipeline_mode = #tpu.pipeline_mode<synchronous>, transform_indices = @transform_2, window_bounds = array<i64: 128, 128>}, {pipeline_mode = #tpu.pipeline_mode<synchronous>, transform_indices = @transform_3, window_bounds = array<i64: 128, 128>}, {transform_indices = @transform_4, window_bounds = array<i64: 8, 128>}, {transform_indices = @transform_5, window_bounds = array<i64: 8, 128>}]} {
    %c0 = arith.constant 0 : index
    %c0_0 = arith.constant 0 : index
    %0 = vector.load %arg1[%c0, %c0_0] : memref<8x128xf32, #tpu.memory_space<vmem>>, vector<8x128xf32>
    %c0_1 = arith.constant 0 : index
    %c0_2 = arith.constant 0 : index
    %1 = vector.load %arg2[%c0_1, %c0_2] : memref<8x128xf32, #tpu.memory_space<vmem>>, vector<8x128xf32>
    %2 = arith.truncf %0 : vector<8x128xf32> to vector<8x128xbf16>
    %3 = arith.truncf %1 : vector<8x128xf32> to vector<8x128xbf16>
    %c0_3 = arith.constant 0 : index
    %c0_4 = arith.constant 0 : index
    %4 = vector.load %arg3[%c0_3, %c0_4] : memref<128x128xbf16, #tpu.memory_space<vmem>>, vector<128x128xbf16>
    %cst = arith.constant dense<0.000000e+00> : vector<8x128xf32>
    %5 = tpu.matmul %2, %4, %cst {dimension_numbers = #tpu.dot_dimension_numbers<[1], [0], [0], [1], [0, 0, 1, 1], [], []>} : vector<8x128xbf16>, vector<128x128xbf16>, vector<8x128xf32> -> vector<8x128xf32>
    %6 = arith.negf %5 : vector<8x128xf32>
    %7 = math.exp %6 : vector<8x128xf32>
    %cst_5 = arith.constant 1.000000e+00 : f32
    %8 = vector.broadcast %cst_5 : f32 to vector<8x128xf32>
    %9 = arith.addf %8, %7 : vector<8x128xf32>
    %10 = arith.divf %8, %9 : vector<8x128xf32>
    %11 = arith.mulf %10, %1 : vector<8x128xf32>
    %c0_6 = arith.constant 0 : index
    %c0_7 = arith.constant 0 : index
    %12 = vector.load %arg6[%c0_6, %c0_7] : memref<8x128xf32, #tpu.memory_space<vmem>>, vector<8x128xf32>
    tpu.vector_store %arg6[%c0_6, %c0_7], %11 {strides = array<i32>} : memref<8x128xf32, #tpu.memory_space<vmem>>, vector<8x128xf32>,
    %c0_8 = arith.constant 0 : index
    %c0_9 = arith.constant 0 : index
    %13 = vector.load %arg4[%c0_8, %c0_9] : memref<128x128xbf16, #tpu.memory_space<vmem>>, vector<128x128xbf16>
    %cst_10 = arith.constant dense<0.000000e+00> : vector<8x128xf32>
    %14 = tpu.matmul %3, %13, %cst_10 {dimension_numbers = #tpu.dot_dimension_numbers<[1], [0], [0], [1], [0, 0, 1, 1], [], []>} : vector<8x128xbf16>, vector<128x128xbf16>, vector<8x128xf32> -> vector<8x128xf32>
    %15 = arith.negf %14 : vector<8x128xf32>
    %16 = math.exp %15 : vector<8x128xf32>
    %cst_11 = arith.constant 1.000000e+00 : f32
    %17 = vector.broadcast %cst_11 : f32 to vector<8x128xf32>
    %18 = arith.addf %17, %16 : vector<8x128xf32>
    %19 = arith.divf %17, %18 : vector<8x128xf32>
    %20 = arith.mulf %19, %0 : vector<8x128xf32>
    %c0_12 = arith.constant 0 : index
    %c0_13 = arith.constant 0 : index
    %21 = vector.load %arg5[%c0_12, %c0_13] : memref<8x128xf32, #tpu.memory_space<vmem>>, vector<8x128xf32>
    tpu.vector_store %arg5[%c0_12, %c0_13], %20 {strides = array<i32>} : memref<8x128xf32, #tpu.memory_space<vmem>>, vector<8x128xf32>,
    return
  }
  func.func @transform_0(%arg0: i32) -> (i32, i32) {
    %c0_i32 = arith.constant 0 : i32
    %c0_i32_0 = arith.constant 0 : i32
    return %arg0, %c0_i32 : i32, i32
  }
  func.func @transform_1(%arg0: i32) -> (i32, i32) {
    %c0_i32 = arith.constant 0 : i32
    %c0_i32_0 = arith.constant 0 : i32
    return %arg0, %c0_i32 : i32, i32
  }
  func.func @transform_2(%arg0: i32) -> (i32, i32) {
    %c0_i32 = arith.constant 0 : i32
    %c0_i32_0 = arith.constant 0 : i32
    %c0_i32_1 = arith.constant 0 : i32
    return %c0_i32, %c0_i32_0 : i32, i32
  }
  func.func @transform_3(%arg0: i32) -> (i32, i32) {
    %c0_i32 = arith.constant 0 : i32
    %c0_i32_0 = arith.constant 0 : i32
    %c0_i32_1 = arith.constant 0 : i32
    return %c0_i32, %c0_i32_0 : i32, i32
  }
  func.func @transform_4(%arg0: i32) -> (i32, i32) {
    %c0_i32 = arith.constant 0 : i32
    %c0_i32_0 = arith.constant 0 : i32
    return %arg0, %c0_i32 : i32, i32
  }
  func.func @transform_5(%arg0: i32) -> (i32, i32) {
    %c0_i32 = arith.constant 0 : i32
    %c0_i32_0 = arith.constant 0 : i32
    return %arg0, %c0_i32 : i32, i32
  }
}

</mosaic_0001>

<bundles_post_ra>
// kernel: tpu_custom_call.1
= control target key start
LH: loop header
LB: loop body
LE: loop exit
PB: predicated region body
PF: predicated region fallthrough
CT: control target
= control target key end

     0   :  { %s1374_s0 = inlined_call_operand.hbm [shape: f32[16,128], index: 0, kind: input, shape index: {}]   ;;  %s1375_s1 = inlined_call_operand.hbm [shape: f32[16,128], index: 1, kind: input, shape index: {}]   ;;  %s1376_s2 = inlined_call_operand.hbm [shape: bf16[128,128], index: 2, kind: input, shape index: {}]   ;;  %s1377_s3 = inlined_call_operand.hbm [shape: bf16[128,128], index: 3, kind: input, shape index: {}]   ;;  %s1378_s4 = inlined_call_operand.hbm [shape: f32[16,128], index: 4, kind: output, shape index: {0}]   ;;  %s1379_s5 = inlined_call_operand.hbm [shape: f32[16,128], index: 5, kind: output, shape index: {1}]  }
   0x1   :  { %1381 = sst [smem:[#allocation21_spill]] %s1376_s2 }
   0x2   :  { %1382 = sst [smem:[#allocation22_spill]] %s1377_s3 }
   0x3   :  { %11 = vsyncpa [#allocation3], 0 }
   0x4   :  { %13 = vsyncpa [#allocation3 + $0x1], 0 }
   0x5   :  { %14 = vsyncpa [#allocation6], 0 }
   0x6   :  { %16 = vsyncpa [#allocation6 + $0x1], 0 }
   0x7   :  { %17 = vsyncpa [#allocation9], 0 }
   0x8   :  { %18 = vsyncpa [#allocation4], 0 }
   0x9   :  { %20 = vsyncpa [#allocation4 + $0x1], 0 }
   0xa   :  { %21 = vsyncpa [#allocation12], 0 }
   0xb   :  { %23 = vsyncpa [#allocation12 + $0x1], 0  ;;  %s1162_s18 = smov 0   ;;  %s1164_s19 = smov 0  }
   0xc   :  { %s1166_s20 = smov 0   ;;  %s1168_s21 = smov 0  }
   0xd LB: > { %1383 = sst [smem:[#allocation19_spill]] %s1122_s20  ;;  %s1186_s25 = sadd.s32 4294967295, %s1126_s21   ;;  %s1126_s21 = sphi %s1168_s21, %s1398_s21   ;;  %s1122_s20 = sphi %s1166_s20, %s1395_s20   ;;  %s1118_s19 = sphi %s1164_s19, %s1397_s19   ;;  %s1114_s18 = sphi %s1162_s18, %s1396_s18  }
   0xe   : > { %s1384_s2 = sld [smem:[#allocation21_spill]]  ;;  %p706_p0 = scmp.ge.s32.totalorder %s1126_s21, 1 }
   0xf   : > { %p50_p1 = scmp.eq.s32.totalorder %s1186_s25, 0  ;;  %p180_p2 = scmp.lt.s32.totalorder %s1126_s21, 3 }
  0x10   : > { %s1128_s27 = smov [#allocation7]   ;;  %s1386_s3 = sld [smem:[#allocation22_spill]] }
  0x11   : > { %p1191_p3 = pnand %p706_p0, %p180_p2  ;;  %s193_s28 = sshll.u32 %s1128_s27, 4  ;;  %s194_s28 = int_to_ptr.vmem [resolvable:$true] %s193_s28 }
  0x12   : > { %s1129_s7 = smov [#allocation8]   ;;  %s1130_s9 = smov 64  }
  0x13   : > { %p825_p4 = pneg %p1191_p3  ;;  %s207_s8 = sshll.u32 %s1129_s7, 4  ;;  %s208_s8 = int_to_ptr.vmem [resolvable:$true] %s207_s8 }
  0x14   : > { %s191_s24 = sshll.u32 %s1384_s2, 4  ;;  %s1131_s10 = smov 4   ;;  %s192_s24 = int_to_ptr.hbm [resolvable:$true] %s191_s24 }
  0x15   : > { %p826_p6 = pnand %p825_p4, %p50_p1  ;;  %s705_s11 = sadd.s32 4294967294, %s1126_s21  }
  0x16   : > { %s205_s6 = sshll.u32 %s1386_s3, 4  ;;  %s1205_s12 = sadd.s32 1, %s1126_s21   ;;  %s206_s6 = int_to_ptr.hbm [resolvable:$true] %s205_s6 }
  0x17   : > { %828 = dma.hbm_to_vmem [thread:$0]  (!%p826_p6), %s192_s24, 1024, %s194_s28, [#allocation6], %s1130_s9, %s1130_s9, %s1131_s10  }
  0x18   : > { %831 = dma.hbm_to_vmem [thread:$0]  (!%p826_p6), %s206_s6, 1024, %s208_s8, [#allocation9], %s1130_s9, %s1130_s9, %s1131_s10  }
  0x19   : > { %s33_s13 = ssub.s32 %s1126_s21, %s1205_s12  ;;  %s36_s14 = sadd.s32 1, %s1122_s20 }
  0x1a   : > { %p34_p7 = scmp.eq.s32.totalorder %s33_s13, 0  ;;  %p43_p8 = scmp.ne.s32.totalorder %s1122_s20, %s1118_s19 }
  0x1b   : > { %p44_p9 = scmp.eq.s32.totalorder %s1126_s21, 0  ;;  %p49_p10 = scmp.ne.s32.totalorder %s1118_s19, %s1114_s18 }
  0x1c   : > { %s1216_s15 = scalar_select %p34_p7, %s1122_s20, %s36_s14  }
  0x1d   : > { %p1218_p11 = por %p44_p9, %p43_p8  ;;  %p1224_p12 = por %p50_p1, %p49_p10 }
  0x1e   : > { %1387 = sst [smem:[#allocation20_spill]] %s1216_s15  ;;  %p141_p13 = scmp.eq.s32.totalorder %s1186_s25, 1 }
  0x1f   : > { %p147_p0 = scmp.eq.s32.totalorder %s705_s11, 1  ;;  %p848_p2 = scmp.lt.s32.totalorder %s1126_s21, 2 }
  0x20   : > { %s221_s22 = sand.u32 1, %s1122_s20   ;;  %p1231_p4 = por %p141_p13, %p43_p8 }
  0x21   : > { %p1235_p6 = por %p147_p0, %p49_p10  ;;  %s1239_s27 = sshll.u32 %s221_s22, 3 }
  0x22   : > { %s711_s28 = sshll.u32 %s1126_s21, 3  ;;  %s225_s7 = scalar_lea.vmem [#allocation2], %s1239_s27 }
  0x23   : > { %s229_s6 = scalar_lea.hbm %s1374_s0, %s711_s28  ;;  %s233_s8 = sshll.u32 %s225_s7, 4  ;;  %s234_s8 = int_to_ptr.vmem [resolvable:$true] %s233_s8 }
  0x24   : > { %s231_s9 = sshll.u32 %s229_s6, 4  ;;  %p1248_p7 = pnand %p848_p2, %p1218_p11  ;;  %s232_s9 = int_to_ptr.hbm [resolvable:$true] %s231_s9 }
  0x25   : > { %s248_s14 = scalar_lea.hbm %s1375_s1, %s711_s28  ;;  %s240_s2 = sand.u32 1, %s1126_s21  }
  0x26   : > { %s222_s3 = scalar_lea.sflag [#allocation3], %s221_s22  ;;  %s956_s29 = sshra.s32 %s232_s9, 4  ;;  %s957_s29 = int_to_ptr.hbm [resolvable:$true] %s956_s29 }
  0x27   : > { %s958_s30 = scalar_lea.hbm %s957_s29, 8  ;;  %p960_p9 = pneg %p1248_p7 }
  0x28   : > { %p959_p8 = scmp.ne.s32.totalorder %s957_s29, %s958_s30  ;;  %s963_s7 = scalar_lea.hbm %s1374_s0, 16 }
  0x29   : > { %p964_p13 = scmp.lt.s32.totalorder %s957_s29, %s1374_s0  ;;  %p965_p0 = scmp.lt.s32.totalorder %s963_s7, %s958_s30 }
  0x2a   : > { %p961_p10 = pnand %p960_p9, %p959_p8 }
  0x2b   : > { %p966_p2 = por %p965_p0, %p964_p13 }
  0x2c   : > { %p962_p11 = pneg %p961_p10 }
  0x2e   : > { %p967_p5 = pnand %p966_p2, %p962_p11 }
  0x30   : > { %970 = shalt.err (!%p967_p5)
}
  0x31   : > { %835 = dma.hbm_to_vmem [thread:$0]  (!%p1248_p7), %s232_s9, 128, %s234_s8, %s222_s3  }
  0x32   : > { %s250_s22 = sshll.u32 %s248_s14, 4  ;;  %s244_s28 = scalar_lea.vmem [#allocation5], %s1239_s27  ;;  %s251_s22 = int_to_ptr.hbm [resolvable:$true] %s250_s22 }
  0x33   : > { %s252_s15 = sshll.u32 %s244_s28, 4  ;;  %s241_s16 = scalar_lea.sflag [#allocation6], %s240_s2  ;;  %s253_s15 = int_to_ptr.vmem [resolvable:$true] %s252_s15 }
  0x34   : > { %s986_s6 = sshra.s32 %s251_s22, 4  ;;  %s993_s7 = scalar_lea.hbm %s1375_s1, 16  ;;  %s987_s6 = int_to_ptr.hbm [resolvable:$true] %s986_s6 }
  0x35   : > { %s988_s20 = scalar_lea.hbm %s987_s6, 8  ;;  %p994_p5 = scmp.lt.s32.totalorder %s987_s6, %s1375_s1 }
  0x36   : > { %p989_p8 = scmp.ne.s32.totalorder %s987_s6, %s988_s20  ;;  %p995_p13 = scmp.lt.s32.totalorder %s993_s7, %s988_s20 }
  0x38   : > { %p991_p10 = pnand %p989_p8, %p960_p9  ;;  %p996_p0 = por %p995_p13, %p994_p5 }
  0x3a   : > { %p992_p11 = pneg %p991_p10 }
  0x3c   : > { %p997_p2 = pnand %p996_p0, %p992_p11 }
  0x3e   : > { %1000 = shalt.err (!%p997_p2)
}
  0x3f   : > { %838 = dma.hbm_to_vmem [thread:$0]  (!%p1248_p7), %s251_s22, 128, %s253_s15, %s241_s16  }
  0x40   : > { %261 = sbr.rel (%p1191_p3) target bundleno = 281 (0x119), region = 36  ;;  %s1284_s2 = sand.u32 (!%p1191_p3), 1, %s1118_s19  }
  0x41   : > { %s1287_s27 = sshll.u32 (!%p1191_p3), %s1284_s2, 3  ;;  %s264_s8 = scalar_lea.sflag (!%p1191_p3), [#allocation3], %s1284_s2 }
  0x42   : > { %s267_s20 = scalar_lea.vmem (!%p1191_p3), [#allocation2], %s1287_s27 }
  0x45   : > { %1089 = dma.done.wait (%p1224_p12), %s264_s8, 128  }
  0x46   : > { %1091 = vsyncadd (%p1224_p12), %s264_s8, 4294967168  ;;  %s273_s26 = sand.u32 1, %s1186_s25   ;;  %s277_s9 = scalar_lea.vmem [#allocation5], %s1287_s27 }
  0x47   : > { %s274_s15 = scalar_lea.sflag [#allocation6], %s273_s26 }
  0x48   : > { %1093 = dma.done.wait (%p1224_p12), %s274_s15, 128  }
  0x49   : > { %1095 = vsyncadd (%p1224_p12), %s274_s15, 4294967168 }
  0x4a   : > { %1097 = dma.done.wait (%p50_p1), [#allocation6], 1024  }
  0x4b   : > { %1099 = vsyncadd (%p50_p1), [#allocation6], 4294966272 }
  0x4c   : > { %1101 = dma.done.wait (%p50_p1), [#allocation9], 1024  }
  0x4d   : > { %1103 = vsyncadd (%p50_p1), [#allocation9], 4294966272  ;;  %v800_v0 = vld [vmem:[#allocation7 + $0x38] sm:$0xff]  ;;  %v799_v2 = vld [vmem:[#allocation7 + $0x30] sm:$0xff]  ;;  %s789_s17 = sshll.u32 %s1186_s25, 3  ;;  %s324_s16 = scalar_lea.vmem [#allocation11], %s1287_s27 }
  0x4e   : > { %v808_v1 = vld [vmem:[#allocation8 + $0x38] sm:$0xff]  ;;  %393 = vmatpush.bf16.msra.mxu0 %v800_v0  ;;  %v807_v3 = vld [vmem:[#allocation8 + $0x30] sm:$0xff]  ;;  %v798_v4 = vld [vmem:[#allocation7 + $0x28] sm:$0xff]  ;;  %s555_s13 = scalar_lea.hbm %s1379_s5, %s789_s17  ;;  %s541_s25 = scalar_lea.hbm %s1378_s4, %s789_s17 }
  0x4f   : > { %491 = vmatpush.bf16.msra.mxu1 %v808_v1  ;;  %v806_v5 = vld [vmem:[#allocation8 + $0x28] sm:$0xff]  ;;  %v797_v6 = vld [vmem:[#allocation7 + $0x20] sm:$0xff]  ;;  %v796_v8 = vld [vmem:[#allocation7 + $0x18] sm:$0xff]  ;;  %s1321_s6 = sshll.u32 %s324_s16, 4  ;;  %s559_s29 = sshll.u32 %s555_s13, 4  ;;  %s558_s6 = int_to_ptr.vmem [resolvable:$true] %s1321_s6  ;;  %s560_s29 = int_to_ptr.hbm [resolvable:$true] %s559_s29 }
  0x50   : > { %v805_v7 = vld [vmem:[#allocation8 + $0x20] sm:$0xff]  ;;  %v804_v9 = vld [vmem:[#allocation8 + $0x18] sm:$0xff]  ;;  %v795_v10 = vld [vmem:[#allocation7 + $0x10] sm:$0xff]  ;;  %s317_s30 = scalar_lea.vmem [#allocation10], %s1287_s27  ;;  %s545_s11 = sshll.u32 %s541_s25, 4  ;;  %s1328_s11 = int_to_ptr.hbm [resolvable:$true] %s545_s11 }
  0x51   : > { %v803_v11 = vld [vmem:[#allocation8 + $0x10] sm:$0xff]  ;;  %v794_v12 = vld [vmem:[#allocation7 + $0x8] sm:$0xff]  ;;  %v793_v14 = vld [vmem:[#allocation7] sm:$0xff]  ;;  %s1324_s7 = sshll.u32 %s317_s30, 4  ;;  %s531_s3 = scalar_lea.sflag [#allocation12], %s1284_s2  ;;  %s544_s7 = int_to_ptr.vmem [resolvable:$true] %s1324_s7 }
  0x52   : > { %394 = vmatpush.bf16.msra.mxu0 %v799_v2  ;;  %v802_v13 = vld [vmem:[#allocation8 + $0x8] sm:$0xff]  ;;  %v801_v15 = vld [vmem:[#allocation8] sm:$0xff]  ;;  %v326_v17 = vld [vmem:[%s277_s9] sm:$0xff]  ;;  %s1030_s27 = sshra.s32 %s560_s29, 4  ;;  %s1036_s15 = scalar_lea.hbm %s1379_s5, 16  ;;  %s1031_s27 = int_to_ptr.hbm [resolvable:$true] %s1030_s27 }
  0x53   : > { %492 = vmatpush.bf16.msra.mxu1 %v807_v3  ;;  %v325_v16 = vld [vmem:[%s267_s20] sm:$0xff]  ;;  %v328_v19 = vpack.c.bf16 %v326_v17, %v326_v17  ;;  %s1032_s8 = scalar_lea.hbm %s1031_s27, 8  ;;  %p1037_p7 = scmp.lt.s32.totalorder %s1031_s27, %s1379_s5 }
  0x54   : > { %v327_v18 = vpack.c.bf16 %v325_v16, %v325_v16  ;;  %p1033_p1 = scmp.ne.s32.totalorder %s1031_s27, %s1032_s8  ;;  %p1038_p9 = scmp.lt.s32.totalorder %s1036_s15, %s1032_s8 }
  0x56   : > { %395 = vmatpush.bf16.msra.mxu0 %v798_v4  ;;  %p1034_p3 = pnand %p1033_p1, %p1231_p4  ;;  %p1039_p8 = por %p1038_p9, %p1037_p7 }
  0x57   : > { %493 = vmatpush.bf16.msra.mxu1 %v806_v5 }
  0x58   : > { %p1035_p12 = pneg %p1034_p3 }
  0x5a   : > { %396 = vmatpush.bf16.msra.mxu0 %v797_v6  ;;  %p1040_p10 = pnand %p1039_p8, %p1035_p12 }
  0x5b   : > { %494 = vmatpush.bf16.msra.mxu1 %v805_v7 }
  0x5e   : > { %397 = vmatpush.bf16.msra.mxu0 %v796_v8 }
  0x5f   : > { %495 = vmatpush.bf16.msra.mxu1 %v804_v9 }
  0x62   : > { %398 = vmatpush.bf16.msra.mxu0 %v795_v10 }
  0x63   : > { %496 = vmatpush.bf16.msra.mxu1 %v803_v11 }
  0x66   : > { %399 = vmatpush.bf16.msra.mxu0 %v794_v12 }
  0x67   : > { %497 = vmatpush.bf16.msra.mxu1 %v802_v13 }
  0x6a   : > { %400 = vmatpush.bf16.msra.mxu0 %v793_v14 }
  0x6b   : > { %498 = vmatpush.bf16.msra.mxu1 %v801_v15 }
  0x6d   : > { %401 = vmatmul.bf16.vlgmr.msra.gmra.mxu0 %v327_v18 }
  0x6e   : > { %499 = vmatmul.bf16.vlgmr.msra.gmra.mxu1 %v328_v19 }
  0xea   : > { %v402_v20 = vpop.f32.mrf.mxu0 }
  0xeb   : > { %v500_v21 = vpop.f32.mrf.mxu1  ;;  %v753_v22 = vmul.f32 -1.442695, %v402_v20 }
  0xec   : > { %v786_v23 = vmul.f32 -1.442695, %v500_v21 }
  0xed   : > { %888 = vpow2.f32 %v753_v22 }
  0xee   : > { %890 = vpow2.f32 %v786_v23 }
  0xf2   : > { %v404_v24 = vpop.f32.mrf.mxu0 }
  0xf3   : > { %v502_v25 = vpop.f32.mrf.mxu1  ;;  %v889_v26 = vpop.eup %888 }
  0xf4   : > { %v891_v27 = vpop.eup %890  ;;  %v409_v28 = vadd.f32 1.0, %v889_v26 }
  0xf5   : > { %v507_v29 = vadd.f32 1.0, %v891_v27 }
  0xf6   : > { %892 = vrcp.f32 %v409_v28  ;;  %v421_v35 = vand.u32 2147483648, %v409_v28  ;;  %v419_v39 = vand.u32 2147483647, %v409_v28  ;;  %vm415_vm2 = vweird.f32 %v409_v28 }
  0xf7   : > { %894 = vrcp.f32 %v507_v29  ;;  %v519_v38 = vand.u32 2147483648, %v507_v29  ;;  %v517_v41 = vand.u32 2147483647, %v507_v29  ;;  %vm513_vm3 = vweird.f32 %v507_v29 }
  0xf8   : > { %v422_v44 = vor.u32 1.1754944e-38, %v421_v35  ;;  %vm420_vm6 = vcmp.eq.f32.partialorder %v419_v39, 8.507059e+37 }
  0xf9   : > { %v520_v45 = vor.u32 1.1754944e-38, %v519_v38  ;;  %vm518_vm7 = vcmp.eq.f32.partialorder %v517_v41, 8.507059e+37 }
  0xfc   : > { %v893_v30 = vpop.eup %892 }
  0xfd   : > { %v895_v31 = vpop.eup %894  ;;  %v411_v32 = vmul.f32 %v893_v30, %v409_v28  ;;  %vm416_vm0 = vweird.f32 %v893_v30 }
  0xfe   : > { %v509_v33 = vmul.f32 %v895_v31, %v507_v29  ;;  %vm514_vm1 = vweird.f32 %v895_v31  ;;  %vm417_vm4 = vmor %vm415_vm2, %vm416_vm0 }
  0xff   : > { %v412_v34 = vsub.f32 1.0, %v411_v32  ;;  %vm515_vm5 = vmor %vm513_vm3, %vm514_vm1 }
 0x100   : > { %v510_v36 = vsub.f32 1.0, %v509_v33 }
 0x101   : > { %v413_v37 = vmul.f32 %v893_v30, %v412_v34 }
 0x102   : > { %v511_v40 = vmul.f32 %v895_v31, %v510_v36 }
 0x103   : > { %v414_v42 = vadd.f32 %v893_v30, %v413_v37 }
 0x104   : > { %v512_v43 = vadd.f32 %v895_v31, %v511_v40 }
 0x105   : > { %v418_v46 = vsel %vm417_vm4, %v893_v30, %v414_v42 }
 0x106   : > { %v516_v47 = vsel %vm515_vm5, %v895_v31, %v512_v43  ;;  %v423_v48 = vsel %vm420_vm6, %v422_v44, %v418_v46 }
 0x107   : > { %v521_v49 = vsel %vm518_vm7, %v520_v45, %v516_v47  ;;  %v425_v50 = vmul.f32 %v423_v48, %v326_v17 }
 0x108   : > { %v523_v51 = vmul.f32 %v521_v49, %v325_v16 }
 0x109   : > { %426 = vst [vmem:[%s324_s16] sm:$0xff] %v425_v50 }
 0x10a   : > { %524 = vst [vmem:[%s317_s30] sm:$0xff] %v523_v51 }
 0x10b   : > { %1043 = shalt.err (!%p1040_p10)
}
 0x10c   : > { %822 = dma.vmem_to_hbm [thread:$0]  (%p1231_p4), %s558_s6, 128, %s560_s29, %s531_s3  }
 0x10d   : > { %s526_s10 = scalar_lea.sflag [#allocation4], %s1284_s2  ;;  %s1058_s14 = sshra.s32 %s1328_s11, 4  ;;  %s1059_s14 = int_to_ptr.hbm [resolvable:$true] %s1058_s14 }
 0x10e   : > { %s1060_s13 = scalar_lea.hbm %s1059_s14, 8  ;;  %s1064_s25 = scalar_lea.hbm %s1378_s4, 16 }
 0x10f   : > { %p1061_p11 = scmp.ne.s32.totalorder %s1059_s14, %s1060_s13  ;;  %p1065_p0 = scmp.lt.s32.totalorder %s1059_s14, %s1378_s4 }
 0x110   : > { %p1066_p2 = scmp.lt.s32.totalorder %s1064_s25, %s1060_s13 }
 0x111   : > { %p1062_p5 = pnand %p1061_p11, %p1231_p4 }
 0x112   : > { %p1067_p1 = por %p1066_p2, %p1065_p0 }
 0x113   : > { %p1063_p13 = pneg %p1062_p5 }
 0x115   : > { %p1068_p3 = pnand %p1067_p1, %p1063_p13 }
 0x117   : > { %1071 = shalt.err (!%p1068_p3)
}
 0x118   : > { %821 = dma.vmem_to_hbm [thread:$0]  (%p1231_p4), %s544_s7, 128, %s1328_s11, %s526_s10  }
 0x119 PF: > { %s571_s2 = sand.u32 1, %s1114_s18   ;;  %p1393_p12 = scmp.ge.s32.totalorder %s1126_s21, 2 }
 0x11a   : > { %s572_s6 = scalar_lea.sflag [#allocation4], %s571_s2 }
 0x11b   : > { %p840_p7 = pnand %p1393_p12, %p1235_p6 }
 0x11d   : > { %p841_p9 = pneg %p840_p7 }
 0x11f   : > { %1105 = dma.done.wait (%p841_p9), %s572_s6, 128  }
 0x120   : > { %1107 = vsyncadd (%p841_p9), %s572_s6, 4294967168  ;;  %s582_s29 = scalar_lea.sflag [#allocation12], %s571_s2 }
 0x121   : > { %1109 = dma.done.wait (%p841_p9), %s582_s29, 128  }
 0x122   : > { %1111 = vsyncadd (%p841_p9), %s582_s29, 4294967168  ;;  %s1394_s23 = sld [smem:[#allocation19_spill]]  ;;  %p26_p4 = scmp.ge.s32.totalorder %s1205_s12, 4  }
 0x123   : > { %s1395_s20 = sld [smem:[#allocation20_spill]]  ;;  %s1396_s18 = smov %s1118_s19 }
 0x124   : > { %s1398_s21 = smov %s1205_s12  ;;  %28 = sbr.rel (!%p26_p4) target bundleno = 13 (0xd), region = 119 }
 0x128   : > { %s1397_s19 = smov %s1394_s23 }
 0x129   :  { %588 = vsyncpa [#allocation3], 1 }
 0x12a   :  { %590 = vsyncpa [#allocation3 + $0x1], 1 }
 0x12b   :  { %591 = vsyncpa [#allocation6], 1 }
 0x12c   :  { %593 = vsyncpa [#allocation6 + $0x1], 1 }
 0x12d   :  { %594 = vsyncpa [#allocation9], 1 }
 0x12e   :  { %595 = vsyncpa [#allocation4], 1 }
 0x12f   :  { %597 = vsyncpa [#allocation4 + $0x1], 1 }
 0x130   :  { %598 = vsyncpa [#allocation12], 1 }
 0x131   :  { %600 = vsyncpa [#allocation12 + $0x1], 1 }

// kernel: tpu_custom_call.1
= control target key start
LH: loop header
LB: loop body
LE: loop exit
PB: predicated region body
PF: predicated region fallthrough
CT: control target
= control target key end

     0   :  { %s1374_s0 = inlined_call_operand.hbm [shape: f32[16,128], index: 0, kind: input, shape index: {}]   ;;  %s1375_s1 = inlined_call_operand.hbm [shape: f32[16,128], index: 1, kind: input, shape index: {}]   ;;  %s1376_s2 = inlined_call_operand.hbm [shape: bf16[128,128], index: 2, kind: input, shape index: {}]   ;;  %s1377_s3 = inlined_call_operand.hbm [shape: bf16[128,128], index: 3, kind: input, shape index: {}]   ;;  %s1378_s4 = inlined_call_operand.hbm [shape: f32[16,128], index: 4, kind: output, shape index: {0}]   ;;  %s1379_s5 = inlined_call_operand.hbm [shape: f32[16,128], index: 5, kind: output, shape index: {1}]  }
   0x1   :  { %1381 = sst [smem:[#allocation21_spill]] %s1376_s2 }
   0x2   :  { %1382 = sst [smem:[#allocation22_spill]] %s1377_s3 }
   0x3   :  { %11 = vsyncpa [#allocation3], 0 }
   0x4   :  { %13 = vsyncpa [#allocation3 + $0x1], 0 }
   0x5   :  { %14 = vsyncpa [#allocation6], 0 }
   0x6   :  { %16 = vsyncpa [#allocation6 + $0x1], 0 }
   0x7   :  { %17 = vsyncpa [#allocation9], 0 }
   0x8   :  { %18 = vsyncpa [#allocation4], 0 }
   0x9   :  { %20 = vsyncpa [#allocation4 + $0x1], 0 }
   0xa   :  { %21 = vsyncpa [#allocation12], 0 }
   0xb   :  { %23 = vsyncpa [#allocation12 + $0x1], 0  ;;  %s1162_s18 = smov 0   ;;  %s1164_s19 = smov 0  }
   0xc   :  { %s1166_s20 = smov 0   ;;  %s1168_s21 = smov 0  }
   0xd LB: > { %1383 = sst [smem:[#allocation19_spill]] %s1122_s20  ;;  %s1186_s25 = sadd.s32 4294967295, %s1126_s21   ;;  %s1126_s21 = sphi %s1168_s21, %s1398_s21   ;;  %s1122_s20 = sphi %s1166_s20, %s1395_s20   ;;  %s1118_s19 = sphi %s1164_s19, %s1397_s19   ;;  %s1114_s18 = sphi %s1162_s18, %s1396_s18  }
   0xe   : > { %s1384_s2 = sld [smem:[#allocation21_spill]]  ;;  %p706_p0 = scmp.ge.s32.totalorder %s1126_s21, 1 }
   0xf   : > { %p50_p1 = scmp.eq.s32.totalorder %s1186_s25, 0  ;;  %p180_p2 = scmp.lt.s32.totalorder %s1126_s21, 3 }
  0x10   : > { %s1128_s27 = smov [#allocation7]   ;;  %s1386_s3 = sld [smem:[#allocation22_spill]] }
  0x11   : > { %p1191_p3 = pnand %p706_p0, %p180_p2  ;;  %s193_s28 = sshll.u32 %s1128_s27, 4  ;;  %s194_s28 = int_to_ptr.vmem [resolvable:$true] %s193_s28 }
  0x12   : > { %s1129_s7 = smov [#allocation8]   ;;  %s1130_s9 = smov 64  }
  0x13   : > { %p825_p4 = pneg %p1191_p3  ;;  %s207_s8 = sshll.u32 %s1129_s7, 4  ;;  %s208_s8 = int_to_ptr.vmem [resolvable:$true] %s207_s8 }
  0x14   : > { %s191_s24 = sshll.u32 %s1384_s2, 4  ;;  %s1131_s10 = smov 4   ;;  %s192_s24 = int_to_ptr.hbm [resolvable:$true] %s191_s24 }
  0x15   : > { %p826_p6 = pnand %p825_p4, %p50_p1  ;;  %s705_s11 = sadd.s32 4294967294, %s1126_s21  }
  0x16   : > { %s205_s6 = sshll.u32 %s1386_s3, 4  ;;  %s1205_s12 = sadd.s32 1, %s1126_s21   ;;  %s206_s6 = int_to_ptr.hbm [resolvable:$true] %s205_s6 }
  0x17   : > { %828 = dma.hbm_to_vmem [thread:$0]  (!%p826_p6), %s192_s24, 1024, %s194_s28, [#allocation6], %s1130_s9, %s1130_s9, %s1131_s10  }
  0x18   : > { %831 = dma.hbm_to_vmem [thread:$0]  (!%p826_p6), %s206_s6, 1024, %s208_s8, [#allocation9], %s1130_s9, %s1130_s9, %s1131_s10  }
  0x19   : > { %s33_s13 = ssub.s32 %s1126_s21, %s1205_s12  ;;  %s36_s14 = sadd.s32 1, %s1122_s20 }
  0x1a   : > { %p34_p7 = scmp.eq.s32.totalorder %s33_s13, 0  ;;  %p43_p8 = scmp.ne.s32.totalorder %s1122_s20, %s1118_s19 }
  0x1b   : > { %p44_p9 = scmp.eq.s32.totalorder %s1126_s21, 0  ;;  %p49_p10 = scmp.ne.s32.totalorder %s1118_s19, %s1114_s18 }
  0x1c   : > { %s1216_s15 = scalar_select %p34_p7, %s1122_s20, %s36_s14  }
  0x1d   : > { %p1218_p11 = por %p44_p9, %p43_p8  ;;  %p1224_p12 = por %p50_p1, %p49_p10 }
  0x1e   : > { %1387 = sst [smem:[#allocation20_spill]] %s1216_s15  ;;  %p141_p13 = scmp.eq.s32.totalorder %s1186_s25, 1 }
  0x1f   : > { %p147_p0 = scmp.eq.s32.totalorder %s705_s11, 1  ;;  %p848_p2 = scmp.lt.s32.totalorder %s1126_s21, 2 }
  0x20   : > { %s221_s22 = sand.u32 1, %s1122_s20   ;;  %p1231_p4 = por %p141_p13, %p43_p8 }
  0x21   : > { %p1235_p6 = por %p147_p0, %p49_p10  ;;  %s1239_s27 = sshll.u32 %s221_s22, 3 }
  0x22   : > { %s711_s28 = sshll.u32 %s1126_s21, 3  ;;  %s225_s7 = scalar_lea.vmem [#allocation2], %s1239_s27 }
  0x23   : > { %s229_s6 = scalar_lea.hbm %s1374_s0, %s711_s28  ;;  %s233_s8 = sshll.u32 %s225_s7, 4  ;;  %s234_s8 = int_to_ptr.vmem [resolvable:$true] %s233_s8 }
  0x24   : > { %s231_s9 = sshll.u32 %s229_s6, 4  ;;  %p1248_p7 = pnand %p848_p2, %p1218_p11  ;;  %s232_s9 = int_to_ptr.hbm [resolvable:$true] %s231_s9 }
  0x25   : > { %s248_s14 = scalar_lea.hbm %s1375_s1, %s711_s28  ;;  %s240_s2 = sand.u32 1, %s1126_s21  }
  0x26   : > { %s222_s3 = scalar_lea.sflag [#allocation3], %s221_s22  ;;  %s956_s29 = sshra.s32 %s232_s9, 4  ;;  %s957_s29 = int_to_ptr.hbm [resolvable:$true] %s956_s29 }
  0x27   : > { %s958_s30 = scalar_lea.hbm %s957_s29, 8  ;;  %p960_p9 = pneg %p1248_p7 }
  0x28   : > { %p959_p8 = scmp.ne.s32.totalorder %s957_s29, %s958_s30  ;;  %s963_s7 = scalar_lea.hbm %s1374_s0, 16 }
  0x29   : > { %p964_p13 = scmp.lt.s32.totalorder %s957_s29, %s1374_s0  ;;  %p965_p0 = scmp.lt.s32.totalorder %s963_s7, %s958_s30 }
  0x2a   : > { %p961_p10 = pnand %p960_p9, %p959_p8 }
  0x2b   : > { %p966_p2 = por %p965_p0, %p964_p13 }
  0x2c   : > { %p962_p11 = pneg %p961_p10 }
  0x2e   : > { %p967_p5 = pnand %p966_p2, %p962_p11 }
  0x30   : > { %970 = shalt.err (!%p967_p5)
}
  0x31   : > { %835 = dma.hbm_to_vmem [thread:$0]  (!%p1248_p7), %s232_s9, 128, %s234_s8, %s222_s3  }
  0x32   : > { %s250_s22 = sshll.u32 %s248_s14, 4  ;;  %s244_s28 = scalar_lea.vmem [#allocation5], %s1239_s27  ;;  %s251_s22 = int_to_ptr.hbm [resolvable:$true] %s250_s22 }
  0x33   : > { %s252_s15 = sshll.u32 %s244_s28, 4  ;;  %s241_s16 = scalar_lea.sflag [#allocation6], %s240_s2  ;;  %s253_s15 = int_to_ptr.vmem [resolvable:$true] %s252_s15 }
  0x34   : > { %s986_s6 = sshra.s32 %s251_s22, 4  ;;  %s993_s7 = scalar_lea.hbm %s1375_s1, 16  ;;  %s987_s6 = int_to_ptr.hbm [resolvable:$true] %s986_s6 }
  0x35   : > { %s988_s20 = scalar_lea.hbm %s987_s6, 8  ;;  %p994_p5 = scmp.lt.s32.totalorder %s987_s6, %s1375_s1 }
  0x36   : > { %p989_p8 = scmp.ne.s32.totalorder %s987_s6, %s988_s20  ;;  %p995_p13 = scmp.lt.s32.totalorder %s993_s7, %s988_s20 }
  0x38   : > { %p991_p10 = pnand %p989_p8, %p960_p9  ;;  %p996_p0 = por %p995_p13, %p994_p5 }
  0x3a   : > { %p992_p11 = pneg %p991_p10 }
  0x3c   : > { %p997_p2 = pnand %p996_p0, %p992_p11 }
  0x3e   : > { %1000 = shalt.err (!%p997_p2)
}
  0x3f   : > { %838 = dma.hbm_to_vmem [thread:$0]  (!%p1248_p7), %s251_s22, 128, %s253_s15, %s241_s16  }
  0x40   : > { %261 = sbr.rel (%p1191_p3) target bundleno = 281 (0x119), region = 36  ;;  %s1284_s2 = sand.u32 (!%p1191_p3), 1, %s1118_s19  }
  0x41   : > { %s1287_s27 = sshll.u32 (!%p1191_p3), %s1284_s2, 3  ;;  %s264_s8 = scalar_lea.sflag (!%p1191_p3), [#allocation3], %s1284_s2 }
  0x42   : > { %s267_s20 = scalar_lea.vmem (!%p1191_p3), [#allocation2], %s1287_s27 }
  0x45   : > { %1089 = dma.done.wait (%p1224_p12), %s264_s8, 128  }
  0x46   : > { %1091 = vsyncadd (%p1224_p12), %s264_s8, 4294967168  ;;  %s273_s26 = sand.u32 1, %s1186_s25   ;;  %s277_s9 = scalar_lea.vmem [#allocation5], %s1287_s27 }
  0x47   : > { %s274_s15 = scalar_lea.sflag [#allocation6], %s273_s26 }
  0x48   : > { %1093 = dma.done.wait (%p1224_p12), %s274_s15, 128  }
  0x49   : > { %1095 = vsyncadd (%p1224_p12), %s274_s15, 4294967168 }
  0x4a   : > { %1097 = dma.done.wait (%p50_p1), [#allocation6], 1024  }
  0x4b   : > { %1099 = vsyncadd (%p50_p1), [#allocation6], 4294966272 }
  0x4c   : > { %1101 = dma.done.wait (%p50_p1), [#allocation9], 1024  }
  0x4d   : > { %1103 = vsyncadd (%p50_p1), [#allocation9], 4294966272  ;;  %v800_v0 = vld [vmem:[#allocation7 + $0x38] sm:$0xff]  ;;  %v799_v2 = vld [vmem:[#allocation7 + $0x30] sm:$0xff]  ;;  %s789_s17 = sshll.u32 %s1186_s25, 3  ;;  %s324_s16 = scalar_lea.vmem [#allocation11], %s1287_s27 }
  0x4e   : > { %v808_v1 = vld [vmem:[#allocation8 + $0x38] sm:$0xff]  ;;  %393 = vmatpush.bf16.msra.mxu0 %v800_v0  ;;  %v807_v3 = vld [vmem:[#allocation8 + $0x30] sm:$0xff]  ;;  %v798_v4 = vld [vmem:[#allocation7 + $0x28] sm:$0xff]  ;;  %s555_s13 = scalar_lea.hbm %s1379_s5, %s789_s17  ;;  %s541_s25 = scalar_lea.hbm %s1378_s4, %s789_s17 }
  0x4f   : > { %491 = vmatpush.bf16.msra.mxu1 %v808_v1  ;;  %v806_v5 = vld [vmem:[#allocation8 + $0x28] sm:$0xff]  ;;  %v797_v6 = vld [vmem:[#allocation7 + $0x20] sm:$0xff]  ;;  %v796_v8 = vld [vmem:[#allocation7 + $0x18] sm:$0xff]  ;;  %s1321_s6 = sshll.u32 %s324_s16, 4  ;;  %s559_s29 = sshll.u32 %s555_s13, 4  ;;  %s558_s6 = int_to_ptr.vmem [resolvable:$true] %s1321_s6  ;;  %s560_s29 = int_to_ptr.hbm [resolvable:$true] %s559_s29 }
  0x50   : > { %v805_v7 = vld [vmem:[#allocation8 + $0x20] sm:$0xff]  ;;  %v804_v9 = vld [vmem:[#allocation8 + $0x18] sm:$0xff]  ;;  %v795_v10 = vld [vmem:[#allocation7 + $0x10] sm:$0xff]  ;;  %s317_s30 = scalar_lea.vmem [#allocation10], %s1287_s27  ;;  %s545_s11 = sshll.u32 %s541_s25, 4  ;;  %s1328_s11 = int_to_ptr.hbm [resolvable:$true] %s545_s11 }
  0x51   : > { %v803_v11 = vld [vmem:[#allocation8 + $0x10] sm:$0xff]  ;;  %v794_v12 = vld [vmem:[#allocation7 + $0x8] sm:$0xff]  ;;  %v793_v14 = vld [vmem:[#allocation7] sm:$0xff]  ;;  %s1324_s7 = sshll.u32 %s317_s30, 4  ;;  %s531_s3 = scalar_lea.sflag [#allocation12], %s1284_s2  ;;  %s544_s7 = int_to_ptr.vmem [resolvable:$true] %s1324_s7 }
  0x52   : > { %394 = vmatpush.bf16.msra.mxu0 %v799_v2  ;;  %v802_v13 = vld [vmem:[#allocation8 + $0x8] sm:$0xff]  ;;  %v801_v15 = vld [vmem:[#allocation8] sm:$0xff]  ;;  %v326_v17 = vld [vmem:[%s277_s9] sm:$0xff]  ;;  %s1030_s27 = sshra.s32 %s560_s29, 4  ;;  %s1036_s15 = scalar_lea.hbm %s1379_s5, 16  ;;  %s1031_s27 = int_to_ptr.hbm [resolvable:$true] %s1030_s27 }
  0x53   : > { %492 = vmatpush.bf16.msra.mxu1 %v807_v3  ;;  %v325_v16 = vld [vmem:[%s267_s20] sm:$0xff]  ;;  %v328_v19 = vpack.c.bf16 %v326_v17, %v326_v17  ;;  %s1032_s8 = scalar_lea.hbm %s1031_s27, 8  ;;  %p1037_p7 = scmp.lt.s32.totalorder %s1031_s27, %s1379_s5 }
  0x54   : > { %v327_v18 = vpack.c.bf16 %v325_v16, %v325_v16  ;;  %p1033_p1 = scmp.ne.s32.totalorder %s1031_s27, %s1032_s8  ;;  %p1038_p9 = scmp.lt.s32.totalorder %s1036_s15, %s1032_s8 }
  0x56   : > { %395 = vmatpush.bf16.msra.mxu0 %v798_v4  ;;  %p1034_p3 = pnand %p1033_p1, %p1231_p4  ;;  %p1039_p8 = por %p1038_p9, %p1037_p7 }
  0x57   : > { %493 = vmatpush.bf16.msra.mxu1 %v806_v5 }
  0x58   : > { %p1035_p12 = pneg %p1034_p3 }
  0x5a   : > { %396 = vmatpush.bf16.msra.mxu0 %v797_v6  ;;  %p1040_p10 = pnand %p1039_p8, %p1035_p12 }
  0x5b   : > { %494 = vmatpush.bf16.msra.mxu1 %v805_v7 }
  0x5e   : > { %397 = vmatpush.bf16.msra.mxu0 %v796_v8 }
  0x5f   : > { %495 = vmatpush.bf16.msra.mxu1 %v804_v9 }
  0x62   : > { %398 = vmatpush.bf16.msra.mxu0 %v795_v10 }
  0x63   : > { %496 = vmatpush.bf16.msra.mxu1 %v803_v11 }
  0x66   : > { %399 = vmatpush.bf16.msra.mxu0 %v794_v12 }
  0x67   : > { %497 = vmatpush.bf16.msra.mxu1 %v802_v13 }
  0x6a   : > { %400 = vmatpush.bf16.msra.mxu0 %v793_v14 }
  0x6b   : > { %498 = vmatpush.bf16.msra.mxu1 %v801_v15 }
  0x6d   : > { %401 = vmatmul.bf16.vlgmr.msra.gmra.mxu0 %v327_v18 }
  0x6e   : > { %499 = vmatmul.bf16.vlgmr.msra.gmra.mxu1 %v328_v19 }
  0xea   : > { %v402_v20 = vpop.f32.mrf.mxu0 }
  0xeb   : > { %v500_v21 = vpop.f32.mrf.mxu1  ;;  %v753_v22 = vmul.f32 -1.442695, %v402_v20 }
  0xec   : > { %v786_v23 = vmul.f32 -1.442695, %v500_v21 }
  0xed   : > { %888 = vpow2.f32 %v753_v22 }
  0xee   : > { %890 = vpow2.f32 %v786_v23 }
  0xf2   : > { %v404_v24 = vpop.f32.mrf.mxu0 }
  0xf3   : > { %v502_v25 = vpop.f32.mrf.mxu1  ;;  %v889_v26 = vpop.eup %888 }
  0xf4   : > { %v891_v27 = vpop.eup %890  ;;  %v409_v28 = vadd.f32 1.0, %v889_v26 }
  0xf5   : > { %v507_v29 = vadd.f32 1.0, %v891_v27 }
  0xf6   : > { %892 = vrcp.f32 %v409_v28  ;;  %v421_v35 = vand.u32 2147483648, %v409_v28  ;;  %v419_v39 = vand.u32 2147483647, %v409_v28  ;;  %vm415_vm2 = vweird.f32 %v409_v28 }
  0xf7   : > { %894 = vrcp.f32 %v507_v29  ;;  %v519_v38 = vand.u32 2147483648, %v507_v29  ;;  %v517_v41 = vand.u32 2147483647, %v507_v29  ;;  %vm513_vm3 = vweird.f32 %v507_v29 }
  0xf8   : > { %v422_v44 = vor.u32 1.1754944e-38, %v421_v35  ;;  %vm420_vm6 = vcmp.eq.f32.partialorder %v419_v39, 8.507059e+37 }
  0xf9   : > { %v520_v45 = vor.u32 1.1754944e-38, %v519_v38  ;;  %vm518_vm7 = vcmp.eq.f32.partialorder %v517_v41, 8.507059e+37 }
  0xfc   : > { %v893_v30 = vpop.eup %892 }
  0xfd   : > { %v895_v31 = vpop.eup %894  ;;  %v411_v32 = vmul.f32 %v893_v30, %v409_v28  ;;  %vm416_vm0 = vweird.f32 %v893_v30 }
  0xfe   : > { %v509_v33 = vmul.f32 %v895_v31, %v507_v29  ;;  %vm514_vm1 = vweird.f32 %v895_v31  ;;  %vm417_vm4 = vmor %vm415_vm2, %vm416_vm0 }
  0xff   : > { %v412_v34 = vsub.f32 1.0, %v411_v32  ;;  %vm515_vm5 = vmor %vm513_vm3, %vm514_vm1 }
 0x100   : > { %v510_v36 = vsub.f32 1.0, %v509_v33 }
 0x101   : > { %v413_v37 = vmul.f32 %v893_v30, %v412_v34 }
 0x102   : > { %v511_v40 = vmul.f32 %v895_v31, %v510_v36 }
 0x103   : > { %v414_v42 = vadd.f32 %v893_v30, %v413_v37 }
 0x104   : > { %v512_v43 = vadd.f32 %v895_v31, %v511_v40 }
 0x105   : > { %v418_v46 = vsel %vm417_vm4, %v893_v30, %v414_v42 }
 0x106   : > { %v516_v47 = vsel %vm515_vm5, %v895_v31, %v512_v43  ;;  %v423_v48 = vsel %vm420_vm6, %v422_v44, %v418_v46 }
 0x107   : > { %v521_v49 = vsel %vm518_vm7, %v520_v45, %v516_v47  ;;  %v425_v50 = vmul.f32 %v423_v48, %v326_v17 }
 0x108   : > { %v523_v51 = vmul.f32 %v521_v49, %v325_v16 }
 0x109   : > { %426 = vst [vmem:[%s324_s16] sm:$0xff] %v425_v50 }
 0x10a   : > { %524 = vst [vmem:[%s317_s30] sm:$0xff] %v523_v51 }
 0x10b   : > { %1043 = shalt.err (!%p1040_p10)
}
 0x10c   : > { %822 = dma.vmem_to_hbm [thread:$0]  (%p1231_p4), %s558_s6, 128, %s560_s29, %s531_s3  }
 0x10d   : > { %s526_s10 = scalar_lea.sflag [#allocation4], %s1284_s2  ;;  %s1058_s14 = sshra.s32 %s1328_s11, 4  ;;  %s1059_s14 = int_to_ptr.hbm [resolvable:$true] %s1058_s14 }
 0x10e   : > { %s1060_s13 = scalar_lea.hbm %s1059_s14, 8  ;;  %s1064_s25 = scalar_lea.hbm %s1378_s4, 16 }
 0x10f   : > { %p1061_p11 = scmp.ne.s32.totalorder %s1059_s14, %s1060_s13  ;;  %p1065_p0 = scmp.lt.s32.totalorder %s1059_s14, %s1378_s4 }
 0x110   : > { %p1066_p2 = scmp.lt.s32.totalorder %s1064_s25, %s1060_s13 }
 0x111   : > { %p1062_p5 = pnand %p1061_p11, %p1231_p4 }
 0x112   : > { %p1067_p1 = por %p1066_p2, %p1065_p0 }
 0x113   : > { %p1063_p13 = pneg %p1062_p5 }
 0x115   : > { %p1068_p3 = pnand %p1067_p1, %p1063_p13 }
 0x117   : > { %1071 = shalt.err (!%p1068_p3)
}
 0x118   : > { %821 = dma.vmem_to_hbm [thread:$0]  (%p1231_p4), %s544_s7, 128, %s1328_s11, %s526_s10  }
 0x119 PF: > { %s571_s2 = sand.u32 1, %s1114_s18   ;;  %p1393_p12 = scmp.ge.s32.totalorder %s1126_s21, 2 }
 0x11a   : > { %s572_s6 = scalar_lea.sflag [#allocation4], %s571_s2 }
 0x11b   : > { %p840_p7 = pnand %p1393_p12, %p1235_p6 }
 0x11d   : > { %p841_p9 = pneg %p840_p7 }
 0x11f   : > { %1105 = dma.done.wait (%p841_p9), %s572_s6, 128  }
 0x120   : > { %1107 = vsyncadd (%p841_p9), %s572_s6, 4294967168  ;;  %s582_s29 = scalar_lea.sflag [#allocation12], %s571_s2 }
 0x121   : > { %1109 = dma.done.wait (%p841_p9), %s582_s29, 128  }
 0x122   : > { %1111 = vsyncadd (%p841_p9), %s582_s29, 4294967168  ;;  %s1394_s23 = sld [smem:[#allocation19_spill]]  ;;  %p26_p4 = scmp.ge.s32.totalorder %s1205_s12, 4  }
 0x123   : > { %s1395_s20 = sld [smem:[#allocation20_spill]]  ;;  %s1396_s18 = smov %s1118_s19 }
 0x124   : > { %s1398_s21 = smov %s1205_s12  ;;  %28 = sbr.rel (!%p26_p4) target bundleno = 13 (0xd), region = 119 }
 0x128   : > { %s1397_s19 = smov %s1394_s23 }
 0x129   :  { %588 = vsyncpa [#allocation3], 1 }
 0x12a   :  { %590 = vsyncpa [#allocation3 + $0x1], 1 }
 0x12b   :  { %591 = vsyncpa [#allocation6], 1 }
 0x12c   :  { %593 = vsyncpa [#allocation6 + $0x1], 1 }
 0x12d   :  { %594 = vsyncpa [#allocation9], 1 }
 0x12e   :  { %595 = vsyncpa [#allocation4], 1 }
 0x12f   :  { %597 = vsyncpa [#allocation4 + $0x1], 1 }
 0x130   :  { %598 = vsyncpa [#allocation12], 1 }
 0x131   :  { %600 = vsyncpa [#allocation12 + $0x1], 1 }

</bundles_post_ra>
